<compile_context>
chip_gen: v6e
topology: v6e:2x2x1
jax: 0.10.0
libtpu: 0.0.40
codegen_flags: <defaults>
</compile_context>

<pallas_src>
import numpy as np
import jax
import jax.numpy as jnp
from jax.experimental import pallas as pl
from jax.experimental.pallas import tpu as pltpu

# ----------------------------- model dims ---------------------------------
N = 2              # batch
C_IN = 4           # input channels
H = W = 16         # spatial
K = 3              # conv kernel (padding=1 -> same spatial size)
FEAT = 32          # backbone output channels == self.fts_dim
NUM_CLASSES = 8    # fcn output dim

P = H * W          # valid spatial positions per sample (256)
CK = K * K * C_IN  # im2col contraction dim (36)
M_ROWS = N * P     # GEMM rows, batch folded in (512)


# ----------------------------- Pallas kernel ------------------------------
def base_tl_kernel(x_ref, w1_ref, b1_ref, pool_ref, w2_ref, b2_ref,
                   out_ref, act_ref):
    # x_ref:    [M_ROWS, CK]        bf16  im2col patches (batch folded into rows)
    # w1_ref:   [CK, FEAT]          bf16  conv weight, (tap, cin)-major
    # b1_ref:   [1, FEAT]           f32
    # pool_ref: [N, M_ROWS]         f32   block-diag GAP matrix (1/(H*W) on own rows)
    # w2_ref:   [FEAT, NUM_CLASSES] f32   fc weight (transposed)
    # b2_ref:   [1, NUM_CLASSES]    f32
    # out_ref:  [N, NUM_CLASSES]    f32
    # act_ref:  [M_ROWS, FEAT]      f32   VMEM scratch for the activation

    # Conv3x3(pad=1) for the WHOLE batch as one MXU matmul (bf16 in, f32 acc),
    # fused with bias + ReLU; result lives in VMEM scratch, not vregs.
    act_ref[...] = jnp.maximum(
        jnp.dot(x_ref[...], w1_ref[...], preferred_element_type=jnp.float32)
        + b1_ref[...], 0.0)

    # Global average pool as an MXU matmul with a lane-dense pooling matrix
    # (512-deep contraction; no mask multiply, no cross-sublane reduction).
    feat = jnp.dot(pool_ref[...], act_ref[...],
                   preferred_element_type=jnp.float32)          # [N, FEAT]

    # Classifier head.
    out_ref[...] = (jnp.dot(feat, w2_ref[...],
                            preferred_element_type=jnp.float32)
                    + b2_ref[...]).astype(out_ref.dtype)


# ------------------- parameter prep (hoisted, run once) --------------------
def prepare_params(conv_w, conv_b, fc_w, fc_b):
    """One-time weight layout transforms (kept off the per-call path)."""
    # [FEAT, C_IN, K, K] (OIHW) -> [(di, dj, cin), FEAT]; ordering matches the
    # wrapper im2col (tap-major, channel-minor).  bf16 for the MXU.
    w1 = jnp.transpose(conv_w, (2, 3, 1, 0)).reshape(CK, FEAT).astype(jnp.bfloat16)
    b1 = conv_b.reshape(1, FEAT).astype(jnp.float32)
    # Block-diagonal pooling matrix: feat[n] = mean over sample n's H*W rows.
    pool = np.kron(np.eye(N, dtype=np.float32),
                   np.full((1, P), 1.0 / P, dtype=np.float32))   # [N, N*P]
    w2 = fc_w.T.astype(jnp.float32)
    b2 = fc_b.reshape(1, NUM_CLASSES).astype(jnp.float32)
    return w1, b1, jnp.asarray(pool), w2, b2


# ----------------------------- forward -------------------------------------
@jax.jit
def base_tl_forward(x_nchw, w1, b1, pool, w2, b2):
    """x_nchw: [N, C_IN, H, W] f32 -> logits [N, NUM_CLASSES] f32."""
    # Wrapper-side im2col over VALID output positions only (~36 KB total):
    # NCHW -> NHWC, zero-pad the border, stack the 9 taps along the channel
    # axis (tap outer, channel inner), flatten (batch, spatial) into GEMM rows.
    # NOTE: activations are cast to bf16 for the MXU (f32 accumulation); this
    # deviates from a pure-f32 PyTorch forward at the ~1e-3 level.
    x = jnp.transpose(x_nchw, (0, 2, 3, 1)).astype(jnp.bfloat16)       # [N,H,W,C]
    xp = jnp.pad(x, ((0, 0), (1, 1), (1, 1), (0, 0)))                  # [N,H+2,W+2,C]
    x_col = jnp.concatenate(
        [xp[:, di:di + H, dj:dj + W, :] for di in range(K) for dj in range(K)],
        axis=-1).reshape(M_ROWS, CK)                                   # [512, 36]

    out = pl.pallas_call(
        base_tl_kernel,
        out_shape=jax.ShapeDtypeStruct((N, NUM_CLASSES), jnp.float32),
        # Single grid step: everything fits easily in VMEM and a per-sample
        # grid only adds fixed per-step overhead on single-TC v5e/v6e (and is
        # not worth the 2-TC split at this size on v7x either).
        in_specs=[pl.BlockSpec(memory_space=pltpu.MemorySpace.VMEM)] * 6,
        out_specs=pl.BlockSpec(memory_space=pltpu.MemorySpace.VMEM),
        scratch_shapes=[pltpu.VMEM((M_ROWS, FEAT), jnp.float32)],
    )(x_col, w1, b1, pool, w2, b2)
    return out


# ----------------------------- reference -----------------------------------
def _reference_forward(x_nchw, conv_w, conv_b, fc_w, fc_b):
    # Mirror the kernel's bf16 conv inputs (f32 accumulation) for a fair check.
    xr = x_nchw.astype(jnp.bfloat16).astype(jnp.float32)
    wr = conv_w.astype(jnp.bfloat16).astype(jnp.float32)
    out = jax.lax.conv_general_dilated(
        xr, wr, window_strides=(1, 1), padding="SAME",
        dimension_numbers=("NCHW", "OIHW", "NCHW"),
        precision=jax.lax.Precision.HIGHEST)
    out = out + conv_b.reshape(1, FEAT, 1, 1)
    out = jnp.maximum(out, 0.0)
    feat = jnp.mean(out, axis=(2, 3))                                  # [N, FEAT]
    return jnp.dot(feat, fc_w.T, precision=jax.lax.Precision.HIGHEST) + fc_b


# ----------------------------- main -----------------------------------------
if __name__ == "__main__":
    key = jax.random.PRNGKey(0)
    kx, kw1, kb1, kw2, kb2 = jax.random.split(key, 5)

    x = jax.random.normal(kx, (N, C_IN, H, W), dtype=jnp.float32)
    conv_w = 0.1 * jax.random.normal(kw1, (FEAT, C_IN, K, K), dtype=jnp.float32)
    conv_b = 0.01 * jax.random.normal(kb1, (FEAT,), dtype=jnp.float32)
    fc_w = 0.1 * jax.random.normal(kw2, (NUM_CLASSES, FEAT), dtype=jnp.float32)
    fc_b = 0.01 * jax.random.normal(kb2, (NUM_CLASSES,), dtype=jnp.float32)

    # Hoisted weight transforms (done once, not per forward call).
    params = prepare_params(conv_w, conv_b, fc_w, fc_b)

    logits = base_tl_forward(x, *params)
    logits = jax.block_until_ready(logits)

    ref = _reference_forward(x, conv_w, conv_b, fc_w, fc_b)
    assert logits.shape == (N, NUM_CLASSES)
    max_err = float(jnp.max(jnp.abs(logits - ref)))
    assert jnp.allclose(logits, ref, atol=5e-3, rtol=5e-3), max_err

    # TODO(synk): get_optimizer / train_model / mixup / export / checkpoint /
    # predict (image IO + plotting) are training/IO utilities with no
    # kernel-level equivalent; only forward() is implemented.
    print("KERNEL_OK")
</pallas_src>

<mosaic_0001>
module attributes {stable_mosaic.version = 11 : i64} {
  func.func @base_tl_kernel(%arg0: memref<512x36xbf16, #tpu.memory_space<vmem>>, %arg1: memref<36x32xbf16, #tpu.memory_space<vmem>>, %arg2: memref<1x32xf32, #tpu.memory_space<vmem>>, %arg3: memref<2x512xf32, #tpu.memory_space<vmem>>, %arg4: memref<32x8xf32, #tpu.memory_space<vmem>>, %arg5: memref<1x8xf32, #tpu.memory_space<vmem>>, %arg6: memref<2x8xf32, #tpu.memory_space<vmem>>, %arg7: memref<512x32xf32, #tpu.memory_space<vmem>>) attributes {dimension_semantics = [], scalar_prefetch = 0 : i64, scratch_operands = 1 : i64, tpu.core_type = #tpu.core_type<tc>} {
    %c0 = arith.constant 0 : index
    %c0_0 = arith.constant 0 : index
    %0 = vector.load %arg0[%c0, %c0_0] : memref<512x36xbf16, #tpu.memory_space<vmem>>, vector<512x36xbf16>
    %c0_1 = arith.constant 0 : index
    %c0_2 = arith.constant 0 : index
    %1 = vector.load %arg1[%c0_1, %c0_2] : memref<36x32xbf16, #tpu.memory_space<vmem>>, vector<36x32xbf16>
    %cst = arith.constant dense<0.000000e+00> : vector<512x32xf32>
    %2 = tpu.matmul %0, %1, %cst {dimension_numbers = #tpu.dot_dimension_numbers<[1], [0], [0], [1], [0, 0, 1, 1], [], []>} : vector<512x36xbf16>, vector<36x32xbf16>, vector<512x32xf32> -> vector<512x32xf32>
    %c0_3 = arith.constant 0 : index
    %c0_4 = arith.constant 0 : index
    %3 = vector.load %arg2[%c0_3, %c0_4] : memref<1x32xf32, #tpu.memory_space<vmem>>, vector<1x32xf32>
    %4 = vector.broadcast %3 : vector<1x32xf32> to vector<512x32xf32>
    %5 = arith.addf %2, %4 : vector<512x32xf32>
    %cst_5 = arith.constant 0.000000e+00 : f32
    %6 = vector.broadcast %cst_5 : f32 to vector<512x32xf32>
    %7 = arith.maximumf %5, %6 : vector<512x32xf32>
    %c0_6 = arith.constant 0 : index
    %c0_7 = arith.constant 0 : index
    %8 = vector.load %arg7[%c0_6, %c0_7] : memref<512x32xf32, #tpu.memory_space<vmem>>, vector<512x32xf32>
    tpu.vector_store %arg7[%c0_6, %c0_7], %7 {strides = array<i32>} : memref<512x32xf32, #tpu.memory_space<vmem>>, vector<512x32xf32>,
    %c0_8 = arith.constant 0 : index
    %c0_9 = arith.constant 0 : index
    %9 = vector.load %arg3[%c0_8, %c0_9] : memref<2x512xf32, #tpu.memory_space<vmem>>, vector<2x512xf32>
    %c0_10 = arith.constant 0 : index
    %c0_11 = arith.constant 0 : index
    %10 = vector.load %arg7[%c0_10, %c0_11] : memref<512x32xf32, #tpu.memory_space<vmem>>, vector<512x32xf32>
    %cst_12 = arith.constant dense<0.000000e+00> : vector<2x32xf32>
    %11 = tpu.matmul %9, %10, %cst_12 {dimension_numbers = #tpu.dot_dimension_numbers<[1], [0], [0], [1], [0, 0, 1, 1], [], []>} : vector<2x512xf32>, vector<512x32xf32>, vector<2x32xf32> -> vector<2x32xf32>
    %c0_13 = arith.constant 0 : index
    %c0_14 = arith.constant 0 : index
    %12 = vector.load %arg4[%c0_13, %c0_14] : memref<32x8xf32, #tpu.memory_space<vmem>>, vector<32x8xf32>
    %cst_15 = arith.constant dense<0.000000e+00> : vector<2x8xf32>
    %13 = tpu.matmul %11, %12, %cst_15 {dimension_numbers = #tpu.dot_dimension_numbers<[1], [0], [0], [1], [0, 0, 1, 1], [], []>} : vector<2x32xf32>, vector<32x8xf32>, vector<2x8xf32> -> vector<2x8xf32>
    %c0_16 = arith.constant 0 : index
    %c0_17 = arith.constant 0 : index
    %14 = vector.load %arg5[%c0_16, %c0_17] : memref<1x8xf32, #tpu.memory_space<vmem>>, vector<1x8xf32>
    %15 = vector.broadcast %14 : vector<1x8xf32> to vector<2x8xf32>
    %16 = arith.addf %13, %15 : vector<2x8xf32>
    %c0_18 = arith.constant 0 : index
    %c0_19 = arith.constant 0 : index
    %17 = vector.load %arg6[%c0_18, %c0_19] : memref<2x8xf32, #tpu.memory_space<vmem>>, vector<2x8xf32>
    tpu.vector_store %arg6[%c0_18, %c0_19], %16 {strides = array<i32>} : memref<2x8xf32, #tpu.memory_space<vmem>>, vector<2x8xf32>,
    return
  }
}

</mosaic_0001>

<bundles_post_ra>
// kernel: base_tl_forward.1
= control target key start
LH: loop header
LB: loop body
LE: loop exit
PB: predicated region body
PF: predicated region fallthrough
CT: control target
= control target key end

     0   :  { %vm373_vm0 = vcmask 1041408   ;;  %vm276_vm1 = vcmask 293888   ;;  %s1794_s0 = inlined_call_operand.vmem [shape: bf16[512,36], index: 0, kind: input, shape index: {}]   ;;  %s1795_s1 = inlined_call_operand.vmem [shape: bf16[36,32], index: 1, kind: input, shape index: {}]   ;;  %s1796_s2 = inlined_call_operand.vmem [shape: f32[1,32], index: 2, kind: input, shape index: {}]   ;;  %s1797_s3 = inlined_call_operand.vmem [shape: f32[2,512], index: 3, kind: input, shape index: {}]   ;;  %s1798_s4 = inlined_call_operand.vmem [shape: f32[32,8], index: 4, kind: input, shape index: {}]   ;;  %s1799_s5 = inlined_call_operand.vmem [shape: f32[1,8], index: 5, kind: input, shape index: {}]   ;;  %s1800_s6 = inlined_call_operand.hbm [shape: f32[2,8], index: 6, kind: output, shape index: {}]  }
   0x1   :  { %v1395_v0 = vld [vmem:[%s1795_s1 + $0x10] ss:$0 sps:$4 sm:$0x33]   ;;  %v1396_v1 = vld [vmem:[%s1795_s1 + $0x8] sm:$0xff]   ;;  %v1398_v3 = vld [vmem:[%s1794_s0] sm:$0xff]  }
   0x2   :  { %1389 = vmatprep.subr.msk.bf16.mxu0 %vm373_vm0, %v1395_v0  ;;  %v375_v2 = vsel %vm373_vm0, %v1395_v0, 0  ;;  %1390 = vmatprep.subr.msk.bf16.mxu1 %vm373_vm0, %v1395_v0  ;;  %v1397_v4 = vld [vmem:[%s1795_s1] sm:$0xff]   ;;  %v1399_v5 = vld [vmem:[%s1794_s0 + $0x8] sm:$0xff]   ;;  %v1400_v6 = vld [vmem:[%s1794_s0 + $0x10] sm:$0xff]  }
   0x3   :  { %1303 = vmatpush3.bf16.msra.mxu0 %v375_v2  ;;  %1386 = vmatpush3.bf16.msra.mxu1 %v375_v2  ;;  %v1401_v7 = vld [vmem:[%s1794_s0 + $0x18] sm:$0xff]   ;;  %v1413_v8 = vld [vmem:[%s1794_s0 + $0xb0] sm:$0xff]   ;;  %v1402_v9 = vld [vmem:[%s1794_s0 + $0x20] sm:$0xff]  }
   0x4   :  { %1304 = vmatprep.subr.bf16.mxu0 %v1396_v1  ;;  %1384 = vmatprep.subr.bf16.mxu1 %v1396_v1  ;;  %v1415_v10 = vld [vmem:[%s1794_s0 + $0xb8] sm:$0xff]   ;;  %v1416_v11 = vld [vmem:[%s1794_s0 + $0xc0] sm:$0xff]   ;;  %v1403_v12 = vld [vmem:[%s1794_s0 + $0x28] sm:$0xff]  }
   0x5   :  { %1308 = vmatprep.mubr.msk.bf16.mxu0 %vm276_vm1, %v1398_v3  ;;  %1352 = vmatprep.mubr.msk.bf16.mxu1 %vm276_vm1, %v1413_v8  ;;  %v1404_v13 = vld [vmem:[%s1794_s0 + $0x30] sm:$0xff]   ;;  %v1417_v14 = vld [vmem:[%s1794_s0 + $0xc8] sm:$0xff]   ;;  %v1405_v16 = vld [vmem:[%s1794_s0 + $0x38] sm:$0xff]  }
   0x6   :  { %v1418_v15 = vld [vmem:[%s1794_s0 + $0xd0] sm:$0xff]   ;;  %v1419_v17 = vld [vmem:[%s1794_s0 + $0xd8] sm:$0xff]   ;;  %v1406_v18 = vld [vmem:[%s1794_s0 + $0x40] sm:$0xff]  }
   0x7   :  { %1305 = vmatpush3.bf16.msra.mxu0 %v1396_v1  ;;  %1387 = vmatpush3.bf16.msra.mxu1 %v1396_v1  ;;  %v1420_v19 = vld [vmem:[%s1794_s0 + $0xe0] sm:$0xff]  }
   0x8   :  { %1306 = vmatprep.subr.bf16.mxu0 %v1397_v4  ;;  %1385 = vmatprep.subr.bf16.mxu1 %v1397_v4 }
   0xb   :  { %1307 = vmatpush3.bf16.msra.mxu0 %v1397_v4  ;;  %1388 = vmatpush3.bf16.msra.mxu1 %v1397_v4 }
   0xe   :  { %1309 = vmatmul.mubr.msk.bf16.vlgmr.msra.gmra.mxu0 %vm276_vm1, %v1399_v5  ;;  %1353 = vmatmul.mubr.msk.bf16.vlgmr.msra.gmra.mxu1 %vm276_vm1, %v1415_v10 }
   0xf   :  { %1312 = vmatprep.mubr.msk.bf16.mxu0 %vm276_vm1, %v1400_v6  ;;  %1356 = vmatprep.mubr.msk.bf16.mxu1 %vm276_vm1, %v1416_v11 }
  0x16   :  { %1313 = vmatmul.mubr.msk.bf16.gmra.mxu0 %vm276_vm1, %v1401_v7  ;;  %1357 = vmatmul.mubr.msk.bf16.gmra.mxu1 %vm276_vm1, %v1417_v14 }
  0x17   :  { %1316 = vmatprep.mubr.msk.bf16.mxu0 %vm276_vm1, %v1402_v9  ;;  %1360 = vmatprep.mubr.msk.bf16.mxu1 %vm276_vm1, %v1418_v15 }
  0x1e   :  { %1317 = vmatmul.mubr.msk.bf16.gmra.mxu0 %vm276_vm1, %v1403_v12 }
  0x1f   :  { %1320 = vmatprep.mubr.msk.bf16.mxu0 %vm276_vm1, %v1404_v13 }
  0x20   :  { %11 = vsyncpa [#allocation4], 0  ;;  %1361 = vmatmul.mubr.msk.bf16.gmra.mxu1 %vm276_vm1, %v1419_v17  ;;  %v1407_v20 = vld [vmem:[%s1794_s0 + $0x48] sm:$0xff]   ;;  %v1408_v22 = vld [vmem:[%s1794_s0 + $0x50] sm:$0xff]   ;;  %v1453_v36 = vmov 1983009808   ;;  %v865_v38 = vlaneseq }
  0x21   :  { %1364 = vmatprep.mubr.msk.bf16.mxu1 %vm276_vm1, %v1420_v19  ;;  %v1422_v21 = vld [vmem:[%s1794_s0 + $0xe8] sm:$0xff]   ;;  %v1424_v23 = vld [vmem:[%s1794_s0 + $0xf0] sm:$0xff]   ;;  %v1409_v24 = vld [vmem:[%s1794_s0 + $0x58] sm:$0xff]   ;;  %v863_v37 = vunpack.c.l.s4 %v1453_v36  ;;  %vm730_vm2 = vcmask 261120   ;;  %vm1455_vm3 = vmmov 0   ;;  %s1456_s27 = smov [#allocation3]  }
  0x22   :  { %v1426_v25 = vld [vmem:[%s1794_s0 + $0xf8] sm:$0xff]   ;;  %v1410_v26 = vld [vmem:[%s1794_s0 + $0x60] sm:$0xff]   ;;  %v1411_v27 = vld [vmem:[%s1794_s0 + $0x68] sm:$0xff]   ;;  %v866_v40 = vshrl.u32 %v865_v38, 7  ;;  %s1114_s28 = sshll.u32 %s1456_s27, 4  ;;  %vm1106_vm4 = vcmask 58368   ;;  %s1115_s28 = int_to_ptr.vmem [resolvable:$true] %s1114_s28 }
  0x23   :  { %v1412_v28 = vld [vmem:[%s1794_s0 + $0x70] sm:$0xff]   ;;  %v1414_v29 = vld [vmem:[%s1794_s0 + $0x78] sm:$0xff]   ;;  %v1421_v30 = vld [vmem:[%s1794_s0 + $0x80] sm:$0xff]   ;;  %v864_v39 = vunpack.c.0.s8 %v863_v37  ;;  %p1436_p1 = scmp.lt.s32.totalorder %s1115_s28, %s1115_s28 }
  0x24   :  { %v1423_v31 = vld [vmem:[%s1794_s0 + $0x88] sm:$0xff]   ;;  %v1425_v32 = vld [vmem:[%s1794_s0 + $0x90] sm:$0xff]   ;;  %v1427_v33 = vld [vmem:[%s1794_s0 + $0x98] sm:$0xff]  }
  0x25   :  { %v1428_v34 = vld [vmem:[%s1794_s0 + $0xa0] sm:$0xff]   ;;  %v1429_v35 = vld [vmem:[%s1794_s0 + $0xa8] sm:$0xff]   ;;  %v867_v41 = vsub.s32 %v864_v39, %v866_v40 }
  0x26   :  { %1321 = vmatmul.mubr.msk.bf16.gmra.mxu0 %vm276_vm1, %v1405_v16  ;;  %v795_v42 = vld [vmem:[%s1797_s3] sm:$0xff] }
  0x27   :  { %1324 = vmatprep.mubr.msk.bf16.mxu0 %vm276_vm1, %v1406_v18  ;;  %v1632_v43 = vrot.slane %v795_v42, %v867_v41  ;;  %v1639_v45 = vld [vmem:[%s1796_s2] ss:$0 sm:$0xff]  ;;  %v861_v49 = vcombine.high %v795_v42, %v795_v42 }
  0x28   :  { %1365 = vmatmul.mubr.msk.bf16.gmra.mxu1 %vm276_vm1, %v1422_v21 }
  0x29   :  { %1368 = vmatprep.mubr.msk.bf16.mxu1 %vm276_vm1, %v1424_v23  ;;  %v876_v44 = vcombine.high %v1632_v43, %v1632_v43  ;;  %v1643_v53 = vrot.slane %v861_v49, %v867_v41 }
  0x2e   :  { %1325 = vmatmul.mubr.msk.bf16.gmra.mxu0 %vm276_vm1, %v1407_v20 }
  0x2f   :  { %1328 = vmatprep.mubr.msk.bf16.mxu0 %vm276_vm1, %v1408_v22 }
  0x30   :  { %1369 = vmatmul.mubr.msk.bf16.gmra.mxu1 %vm276_vm1, %v1426_v25 }
  0x31   :  { %946 = vmatprep.mubr.f32.mxu1 %v876_v44 }
  0x36   :  { %1329 = vmatmul.mubr.msk.bf16.gmra.mxu0 %vm276_vm1, %v1409_v24 }
  0x37   :  { %1332 = vmatprep.mubr.msk.bf16.mxu0 %vm276_vm1, %v1410_v26 }
  0x3e   :  { %1333 = vmatmul.mubr.msk.bf16.gmra.mxu0 %vm276_vm1, %v1411_v27 }
  0x3f   :  { %1336 = vmatprep.mubr.msk.bf16.mxu0 %vm276_vm1, %v1412_v28 }
  0x46   :  { %1337 = vmatmul.mubr.msk.bf16.gmra.mxu0 %vm276_vm1, %v1414_v29 }
  0x47   :  { %1340 = vmatprep.mubr.msk.bf16.mxu0 %vm276_vm1, %v1421_v30 }
  0x4e   :  { %1341 = vmatmul.mubr.msk.bf16.gmra.mxu0 %vm276_vm1, %v1423_v31 }
  0x4f   :  { %1344 = vmatprep.mubr.msk.bf16.mxu0 %vm276_vm1, %v1425_v32 }
  0x56   :  { %1345 = vmatmul.mubr.msk.bf16.gmra.mxu0 %vm276_vm1, %v1427_v33 }
  0x57   :  { %1348 = vmatprep.mubr.msk.bf16.mxu0 %vm276_vm1, %v1428_v34 }
  0x5e   :  { %1349 = vmatmul.mubr.msk.bf16.gmra.mxu0 %vm276_vm1, %v1429_v35 }
  0xce   :  { %v1310_v46 = vpop.f32.mrf.mxu0  ;;  %v1354_v60 = vpop.f32.mrf.mxu1 }
  0xcf   :  { %v420_v47 = vadd.f32 %v1310_v46, %v1639_v45  ;;  %v596_v63 = vadd.f32 %v1354_v60, %v1639_v45 }
  0xd0   :  { %v411_v48 = vpop.f32.mrf.mxu0  ;;  %v587_v1 = vpop.f32.mrf.mxu1 }
  0xd1   :  { %v668_v50 = vmax.f32 %v420_v47, 0.0  ;;  %v412_v51 = vadd.f32 %v1639_v45, %v411_v48  ;;  %v712_v4 = vmax.f32 %v596_v63, 0.0  ;;  %v588_v5 = vadd.f32 %v1639_v45, %v587_v1 }
  0xd2   :  { %v1311_v52 = vpop.f32.mrf.mxu0  ;;  %v1355_v7 = vpop.f32.mrf.mxu1 }
  0xd3   :  { %733 = vst.msk [vmem:[#allocation2 + $0x10] sm:$0xff] %vm730_vm2, %v668_v50  ;;  %v666_v54 = vmax.f32 %v412_v51, 0.0  ;;  %v423_v55 = vadd.f32 %v1311_v52, %v1639_v45  ;;  %777 = vst.msk [vmem:[#allocation2 + $0x170] sm:$0xff] %vm730_vm2, %v712_v4  ;;  %v710_v10 = vmax.f32 %v588_v5, 0.0  ;;  %v599_v11 = vadd.f32 %v1355_v7, %v1639_v45 }
  0xd4   :  { %v414_v56 = vpop.f32.mrf.mxu0  ;;  %v590_v13 = vpop.f32.mrf.mxu1 }
  0xd5   :  { %731 = vst.msk [vmem:[#allocation2] sm:$0xff] %vm730_vm2, %v666_v54  ;;  %v669_v57 = vmax.f32 %v423_v55, 0.0  ;;  %v415_v58 = vadd.f32 %v1639_v45, %v414_v56  ;;  %775 = vst.msk [vmem:[#allocation2 + $0x160] sm:$0xff] %vm730_vm2, %v710_v10  ;;  %v713_v16 = vmax.f32 %v599_v11, 0.0  ;;  %v591_v17 = vadd.f32 %v1639_v45, %v590_v13 }
  0xd6   :  { %v1314_v59 = vpop.f32.mrf.mxu0  ;;  %v1358_v19 = vpop.f32.mrf.mxu1 }
  0xd7   :  { %734 = vst.msk [vmem:[#allocation2 + $0x18] sm:$0xff] %vm730_vm2, %v669_v57  ;;  %v667_v61 = vmax.f32 %v415_v58, 0.0  ;;  %v436_v62 = vadd.f32 %v1314_v59, %v1639_v45  ;;  %778 = vst.msk [vmem:[#allocation2 + $0x178] sm:$0xff] %vm730_vm2, %v713_v16  ;;  %v711_v22 = vmax.f32 %v591_v17, 0.0  ;;  %v612_v23 = vadd.f32 %v1358_v19, %v1639_v45 }
  0xd8   :  { %v427_v0 = vpop.f32.mrf.mxu0  ;;  %v603_v25 = vpop.f32.mrf.mxu1 }
  0xd9   :  { %732 = vst.msk [vmem:[#allocation2 + $0x8] sm:$0xff] %vm730_vm2, %v667_v61  ;;  %v672_v2 = vmax.f32 %v436_v62, 0.0  ;;  %v428_v3 = vadd.f32 %v1639_v45, %v427_v0  ;;  %776 = vst.msk [vmem:[#allocation2 + $0x168] sm:$0xff] %vm730_vm2, %v711_v22  ;;  %v716_v28 = vmax.f32 %v612_v23, 0.0  ;;  %v604_v29 = vadd.f32 %v1639_v45, %v603_v25 }
  0xda   :  { %v1315_v6 = vpop.f32.mrf.mxu0  ;;  %v1359_v31 = vpop.f32.mrf.mxu1 }
  0xdb   :  { %737 = vst.msk [vmem:[#allocation2 + $0x30] sm:$0xff] %vm730_vm2, %v672_v2  ;;  %v670_v8 = vmax.f32 %v428_v3, 0.0  ;;  %v439_v9 = vadd.f32 %v1315_v6, %v1639_v45  ;;  %781 = vst.msk [vmem:[#allocation2 + $0x190] sm:$0xff] %vm730_vm2, %v716_v28  ;;  %v714_v34 = vmax.f32 %v604_v29, 0.0  ;;  %v615_v35 = vadd.f32 %v1359_v31, %v1639_v45 }
  0xdc   :  { %v430_v12 = vpop.f32.mrf.mxu0  ;;  %v606_v37 = vpop.f32.mrf.mxu1 }
  0xdd   :  { %735 = vst.msk [vmem:[#allocation2 + $0x20] sm:$0xff] %vm730_vm2, %v670_v8  ;;  %v673_v14 = vmax.f32 %v439_v9, 0.0  ;;  %v431_v15 = vadd.f32 %v1639_v45, %v430_v12  ;;  %779 = vst.msk [vmem:[#allocation2 + $0x180] sm:$0xff] %vm730_vm2, %v714_v34  ;;  %v717_v40 = vmax.f32 %v615_v35, 0.0  ;;  %v607_v41 = vadd.f32 %v1639_v45, %v606_v37 }
  0xde   :  { %v1318_v18 = vpop.f32.mrf.mxu0 }
  0xdf   :  { %738 = vst.msk [vmem:[#allocation2 + $0x38] sm:$0xff] %vm730_vm2, %v673_v14  ;;  %v671_v20 = vmax.f32 %v431_v15, 0.0  ;;  %v452_v21 = vadd.f32 %v1318_v18, %v1639_v45  ;;  %782 = vst.msk [vmem:[#allocation2 + $0x198] sm:$0xff] %vm730_vm2, %v717_v40  ;;  %v715_v48 = vmax.f32 %v607_v41, 0.0 }
  0xe0   :  { %v443_v24 = vpop.f32.mrf.mxu0  ;;  %v1362_v44 = vpop.f32.mrf.mxu1 }
  0xe1   :  { %736 = vst.msk [vmem:[#allocation2 + $0x28] sm:$0xff] %vm730_vm2, %v671_v20  ;;  %v676_v26 = vmax.f32 %v452_v21, 0.0  ;;  %v444_v27 = vadd.f32 %v1639_v45, %v443_v24  ;;  %v628_v49 = vadd.f32 %v1362_v44, %v1639_v45  ;;  %780 = vst.msk [vmem:[#allocation2 + $0x188] sm:$0xff] %vm730_vm2, %v715_v48 }
  0xe2   :  { %v1319_v30 = vpop.f32.mrf.mxu0  ;;  %v619_v51 = vpop.f32.mrf.mxu1 }
  0xe3   :  { %741 = vst.msk [vmem:[#allocation2 + $0x50] sm:$0xff] %vm730_vm2, %v676_v26  ;;  %v674_v32 = vmax.f32 %v444_v27, 0.0  ;;  %v455_v33 = vadd.f32 %v1319_v30, %v1639_v45  ;;  %v720_v55 = vmax.f32 %v628_v49, 0.0  ;;  %v620_v56 = vadd.f32 %v1639_v45, %v619_v51 }
  0xe4   :  { %v446_v36 = vpop.f32.mrf.mxu0  ;;  %v1363_v58 = vpop.f32.mrf.mxu1 }
  0xe5   :  { %739 = vst.msk [vmem:[#allocation2 + $0x40] sm:$0xff] %vm730_vm2, %v674_v32  ;;  %v677_v38 = vmax.f32 %v455_v33, 0.0  ;;  %v447_v39 = vadd.f32 %v1639_v45, %v446_v36  ;;  %785 = vst.msk [vmem:[#allocation2 + $0x1b0] sm:$0xff] %vm730_vm2, %v720_v55  ;;  %v718_v61 = vmax.f32 %v620_v56, 0.0  ;;  %v631_v62 = vadd.f32 %v1363_v58, %v1639_v45 }
  0xe6   :  { %v1322_v42 = vpop.f32.mrf.mxu0  ;;  %v622_v0 = vpop.f32.mrf.mxu1 }
  0xe7   :  { %742 = vst.msk [vmem:[#allocation2 + $0x58] sm:$0xff] %vm730_vm2, %v677_v38  ;;  %v675_v46 = vmax.f32 %v447_v39, 0.0  ;;  %v468_v47 = vadd.f32 %v1322_v42, %v1639_v45  ;;  %783 = vst.msk [vmem:[#allocation2 + $0x1a0] sm:$0xff] %vm730_vm2, %v718_v61  ;;  %v721_v3 = vmax.f32 %v631_v62, 0.0  ;;  %v623_v4 = vadd.f32 %v1639_v45, %v622_v0 }
  0xe8   :  { %v459_v50 = vpop.f32.mrf.mxu0  ;;  %v1366_v6 = vpop.f32.mrf.mxu1 }
  0xe9   :  { %740 = vst.msk [vmem:[#allocation2 + $0x48] sm:$0xff] %vm730_vm2, %v675_v46  ;;  %v680_v52 = vmax.f32 %v468_v47, 0.0  ;;  %v460_v54 = vadd.f32 %v1639_v45, %v459_v50  ;;  %786 = vst.msk [vmem:[#allocation2 + $0x1b8] sm:$0xff] %vm730_vm2, %v721_v3  ;;  %v719_v9 = vmax.f32 %v623_v4, 0.0  ;;  %v644_v10 = vadd.f32 %v1366_v6, %v1639_v45 }
  0xea   :  { %v1323_v57 = vpop.f32.mrf.mxu0  ;;  %v635_v12 = vpop.f32.mrf.mxu1 }
  0xeb   :  { %745 = vst.msk [vmem:[#allocation2 + $0x70] sm:$0xff] %vm730_vm2, %v680_v52  ;;  %v678_v59 = vmax.f32 %v460_v54, 0.0  ;;  %v471_v60 = vadd.f32 %v1323_v57, %v1639_v45  ;;  %784 = vst.msk [vmem:[#allocation2 + $0x1a8] sm:$0xff] %vm730_vm2, %v719_v9  ;;  %v724_v15 = vmax.f32 %v644_v10, 0.0  ;;  %v636_v16 = vadd.f32 %v1639_v45, %v635_v12 }
  0xec   :  { %v462_v63 = vpop.f32.mrf.mxu0  ;;  %v1367_v18 = vpop.f32.mrf.mxu1 }
  0xed   :  { %743 = vst.msk [vmem:[#allocation2 + $0x60] sm:$0xff] %vm730_vm2, %v678_v59  ;;  %v681_v1 = vmax.f32 %v471_v60, 0.0  ;;  %v463_v2 = vadd.f32 %v1639_v45, %v462_v63  ;;  %789 = vst.msk [vmem:[#allocation2 + $0x1d0] sm:$0xff] %vm730_vm2, %v724_v15  ;;  %v722_v21 = vmax.f32 %v636_v16, 0.0  ;;  %v647_v22 = vadd.f32 %v1367_v18, %v1639_v45 }
  0xee   :  { %v1326_v5 = vpop.f32.mrf.mxu0  ;;  %v638_v24 = vpop.f32.mrf.mxu1 }
  0xef   :  { %746 = vst.msk [vmem:[#allocation2 + $0x78] sm:$0xff] %vm730_vm2, %v681_v1  ;;  %v679_v7 = vmax.f32 %v463_v2, 0.0  ;;  %v484_v8 = vadd.f32 %v1326_v5, %v1639_v45  ;;  %787 = vst.msk [vmem:[#allocation2 + $0x1c0] sm:$0xff] %vm730_vm2, %v722_v21  ;;  %v725_v27 = vmax.f32 %v647_v22, 0.0  ;;  %v639_v28 = vadd.f32 %v1639_v45, %v638_v24 }
  0xf0   :  { %v475_v11 = vpop.f32.mrf.mxu0  ;;  %v1370_v30 = vpop.f32.mrf.mxu1 }
  0xf1   :  { %744 = vst.msk [vmem:[#allocation2 + $0x68] sm:$0xff] %vm730_vm2, %v679_v7  ;;  %v684_v13 = vmax.f32 %v484_v8, 0.0  ;;  %v476_v14 = vadd.f32 %v1639_v45, %v475_v11  ;;  %790 = vst.msk [vmem:[#allocation2 + $0x1d8] sm:$0xff] %vm730_vm2, %v725_v27  ;;  %v723_v33 = vmax.f32 %v639_v28, 0.0  ;;  %v660_v34 = vadd.f32 %v1370_v30, %v1639_v45 }
  0xf2   :  { %v1327_v17 = vpop.f32.mrf.mxu0  ;;  %v651_v36 = vpop.f32.mrf.mxu1 }
  0xf3   :  { %749 = vst.msk [vmem:[#allocation2 + $0x90] sm:$0xff] %vm730_vm2, %v684_v13  ;;  %v682_v19 = vmax.f32 %v476_v14, 0.0  ;;  %v487_v20 = vadd.f32 %v1327_v17, %v1639_v45  ;;  %788 = vst.msk [vmem:[#allocation2 + $0x1c8] sm:$0xff] %vm730_vm2, %v723_v33  ;;  %v728_v39 = vmax.f32 %v660_v34, 0.0  ;;  %v652_v40 = vadd.f32 %v1639_v45, %v651_v36  ;;  %v810_v36 = vld [vmem:[#allocation2 + $0x70] sm:$0xff] }
  0xf4   :  { %v478_v23 = vpop.f32.mrf.mxu0  ;;  %v1371_v42 = vpop.f32.mrf.mxu1 }
  0xf5   :  { %747 = vst.msk [vmem:[#allocation2 + $0x80] sm:$0xff] %vm730_vm2, %v682_v19  ;;  %v685_v25 = vmax.f32 %v487_v20, 0.0  ;;  %v479_v26 = vadd.f32 %v1639_v45, %v478_v23  ;;  %793 = vst.msk [vmem:[#allocation2 + $0x1f0] sm:$0xff] %vm730_vm2, %v728_v39  ;;  %v726_v47 = vmax.f32 %v652_v40, 0.0  ;;  %v663_v48 = vadd.f32 %v1371_v42, %v1639_v45 }
  0xf6   :  { %v1330_v29 = vpop.f32.mrf.mxu0  ;;  %v654_v50 = vpop.f32.mrf.mxu1 }
  0xf7   :  { %750 = vst.msk [vmem:[#allocation2 + $0x98] sm:$0xff] %vm730_vm2, %v685_v25  ;;  %v683_v31 = vmax.f32 %v479_v26, 0.0  ;;  %v500_v32 = vadd.f32 %v1330_v29, %v1639_v45  ;;  %791 = vst.msk [vmem:[#allocation2 + $0x1e0] sm:$0xff] %vm730_vm2, %v726_v47  ;;  %v729_v54 = vmax.f32 %v663_v48, 0.0  ;;  %v655_v55 = vadd.f32 %v1639_v45, %v654_v50  ;;  %v808_v48 = vld [vmem:[#allocation2 + $0x60] sm:$0xff] }
  0xf8   :  { %v491_v35 = vpop.f32.mrf.mxu0 }
  0xf9   :  { %748 = vst.msk [vmem:[#allocation2 + $0x88] sm:$0xff] %vm730_vm2, %v683_v31  ;;  %v688_v37 = vmax.f32 %v500_v32, 0.0  ;;  %v492_v38 = vadd.f32 %v1639_v45, %v491_v35  ;;  %794 = vst.msk [vmem:[#allocation2 + $0x1f8] sm:$0xff] %vm730_vm2, %v729_v54  ;;  %v727_v59 = vmax.f32 %v655_v55, 0.0  ;;  %v811_v31 = vld [vmem:[#allocation2 + $0x78] sm:$0xff] }
  0xfa   :  { %v1331_v41 = vpop.f32.mrf.mxu0  ;;  %v807_v54 = vld [vmem:[#allocation2 + $0x58] sm:$0xff] }
  0xfb   :  { %753 = vst.msk [vmem:[#allocation2 + $0xb0] sm:$0xff] %vm730_vm2, %v688_v37  ;;  %v686_v44 = vmax.f32 %v492_v38, 0.0  ;;  %v503_v46 = vadd.f32 %v1331_v41, %v1639_v45  ;;  %792 = vst.msk [vmem:[#allocation2 + $0x1e8] sm:$0xff] %vm730_vm2, %v727_v59  ;;  %v809_v41 = vld [vmem:[#allocation2 + $0x68] sm:$0xff]  ;;  %v806_v59 = vld [vmem:[#allocation2 + $0x50] sm:$0xff] }
  0xfc   :  { %v494_v49 = vpop.f32.mrf.mxu0 }
  0xfd   :  { %751 = vst.msk [vmem:[#allocation2 + $0xa0] sm:$0xff] %vm730_vm2, %v686_v44  ;;  %v689_v51 = vmax.f32 %v503_v46, 0.0  ;;  %v495_v52 = vadd.f32 %v1639_v45, %v494_v49 }
  0xfe   :  { %v1334_v56 = vpop.f32.mrf.mxu0 }
  0xff   :  { %754 = vst.msk [vmem:[#allocation2 + $0xb8] sm:$0xff] %vm730_vm2, %v689_v51  ;;  %v687_v57 = vmax.f32 %v495_v52, 0.0  ;;  %v516_v58 = vadd.f32 %v1334_v56, %v1639_v45 }
 0x100   :  { %v507_v60 = vpop.f32.mrf.mxu0 }
 0x101   :  { %752 = vst.msk [vmem:[#allocation2 + $0xa8] sm:$0xff] %vm730_vm2, %v687_v57  ;;  %v692_v61 = vmax.f32 %v516_v58, 0.0  ;;  %v508_v62 = vadd.f32 %v1639_v45, %v507_v60 }
 0x102   :  { %v1335_v63 = vpop.f32.mrf.mxu0 }
 0x103   :  { %757 = vst.msk [vmem:[#allocation2 + $0xd0] sm:$0xff] %vm730_vm2, %v692_v61  ;;  %v690_v0 = vmax.f32 %v508_v62, 0.0  ;;  %v519_v1 = vadd.f32 %v1335_v63, %v1639_v45 }
 0x104   :  { %v510_v2 = vpop.f32.mrf.mxu0 }
 0x105   :  { %755 = vst.msk [vmem:[#allocation2 + $0xc0] sm:$0xff] %vm730_vm2, %v690_v0  ;;  %v693_v3 = vmax.f32 %v519_v1, 0.0  ;;  %v511_v4 = vadd.f32 %v1639_v45, %v510_v2  ;;  %v805_v0 = vld [vmem:[#allocation2 + $0x48] sm:$0xff] }
 0x106   :  { %v1338_v5 = vpop.f32.mrf.mxu0 }
 0x107   :  { %758 = vst.msk [vmem:[#allocation2 + $0xd8] sm:$0xff] %vm730_vm2, %v693_v3  ;;  %v691_v6 = vmax.f32 %v511_v4, 0.0  ;;  %v532_v7 = vadd.f32 %v1338_v5, %v1639_v45  ;;  %v804_v5 = vld [vmem:[#allocation2 + $0x40] sm:$0xff] }
 0x108   :  { %v523_v8 = vpop.f32.mrf.mxu0 }
 0x109   :  { %756 = vst.msk [vmem:[#allocation2 + $0xc8] sm:$0xff] %vm730_vm2, %v691_v6  ;;  %v696_v9 = vmax.f32 %v532_v7, 0.0  ;;  %v524_v10 = vadd.f32 %v1639_v45, %v523_v8  ;;  %v819_v8 = vld [vmem:[#allocation2 + $0xb8] sm:$0xff] }
 0x10a   :  { %v1339_v11 = vpop.f32.mrf.mxu0  ;;  %v822_v57 = vld [vmem:[#allocation2 + $0xd0] sm:$0xff] }
 0x10b   :  { %761 = vst.msk [vmem:[#allocation2 + $0xf0] sm:$0xff] %vm730_vm2, %v696_v9  ;;  %v694_v12 = vmax.f32 %v524_v10, 0.0  ;;  %v535_v13 = vadd.f32 %v1339_v11, %v1639_v45  ;;  %v803_v9 = vld [vmem:[#allocation2 + $0x38] sm:$0xff]  ;;  %v818_v11 = vld [vmem:[#allocation2 + $0xb0] sm:$0xff] }
 0x10c   :  { %v526_v14 = vpop.f32.mrf.mxu0  ;;  %v820_v3 = vld [vmem:[#allocation2 + $0xc0] sm:$0xff] }
 0x10d   :  { %759 = vst.msk [vmem:[#allocation2 + $0xe0] sm:$0xff] %vm730_vm2, %v694_v12  ;;  %v697_v15 = vmax.f32 %v535_v13, 0.0  ;;  %v527_v16 = vadd.f32 %v1639_v45, %v526_v14  ;;  %v802_v12 = vld [vmem:[#allocation2 + $0x30] sm:$0xff]  ;;  %v817_v13 = vld [vmem:[#allocation2 + $0xa8] sm:$0xff] }
 0x10e   :  { %v1342_v17 = vpop.f32.mrf.mxu0  ;;  %v823_v51 = vld [vmem:[#allocation2 + $0xd8] sm:$0xff]  ;;  %v801_v14 = vld [vmem:[#allocation2 + $0x28] sm:$0xff] }
 0x10f   :  { %762 = vst.msk [vmem:[#allocation2 + $0xf8] sm:$0xff] %vm730_vm2, %v697_v15  ;;  %v695_v18 = vmax.f32 %v527_v16, 0.0  ;;  %v548_v19 = vadd.f32 %v1342_v17, %v1639_v45  ;;  %v816_v15 = vld [vmem:[#allocation2 + $0xa0] sm:$0xff]  ;;  %v815_v16 = vld [vmem:[#allocation2 + $0x98] sm:$0xff] }
 0x110   :  { %v539_v20 = vpop.f32.mrf.mxu0  ;;  %v821_v62 = vld [vmem:[#allocation2 + $0xc8] sm:$0xff]  ;;  %v799_v17 = vld [vmem:[#allocation2 + $0x18] sm:$0xff] }
 0x111   :  { %760 = vst.msk [vmem:[#allocation2 + $0xe8] sm:$0xff] %vm730_vm2, %v695_v18  ;;  %v700_v21 = vmax.f32 %v548_v19, 0.0  ;;  %v540_v22 = vadd.f32 %v1639_v45, %v539_v20  ;;  %v814_v18 = vld [vmem:[#allocation2 + $0x90] sm:$0xff]  ;;  %v813_v20 = vld [vmem:[#allocation2 + $0x88] sm:$0xff] }
 0x112   :  { %v1343_v23 = vpop.f32.mrf.mxu0  ;;  %v826_v34 = vld [vmem:[#allocation2 + $0xf0] sm:$0xff] }
 0x113   :  { %765 = vst.msk [vmem:[#allocation2 + $0x110] sm:$0xff] %vm730_vm2, %v700_v21  ;;  %v698_v24 = vmax.f32 %v540_v22, 0.0  ;;  %v551_v25 = vadd.f32 %v1343_v23, %v1639_v45  ;;  %v798_v19 = vld [vmem:[#allocation2 + $0x10] sm:$0xff]  ;;  %v797_v21 = vld [vmem:[#allocation2 + $0x8] sm:$0xff]  ;;  %v812_v22 = vld [vmem:[#allocation2 + $0x80] sm:$0xff]  ;;  %v877_v23 = vcombine.high %v1643_v53, %v1643_v53 }
 0x114   :  { %v542_v26 = vpop.f32.mrf.mxu0  ;;  %v824_v46 = vld [vmem:[#allocation2 + $0xe0] sm:$0xff] }
 0x115   :  { %763 = vst.msk [vmem:[#allocation2 + $0x100] sm:$0xff] %vm730_vm2, %v698_v24  ;;  %v701_v27 = vmax.f32 %v551_v25, 0.0  ;;  %v543_v28 = vadd.f32 %v1639_v45, %v542_v26  ;;  %v796_v24 = vld [vmem:[#allocation2] sm:$0xff]  ;;  %v859_v25 = vld [vmem:[#allocation2 + $0x1f8] sm:$0xff] }
 0x116   :  { %v827_v29 = vld [vmem:[#allocation2 + $0xf8] sm:$0xff]  ;;  %v1346_v30 = vpop.f32.mrf.mxu0 }
 0x117   :  { %1227 = vmatprep.subr.mxu1 %v827_v29  ;;  %766 = vst.msk [vmem:[#allocation2 + $0x118] sm:$0xff] %vm730_vm2, %v701_v27  ;;  %v699_v32 = vmax.f32 %v543_v28, 0.0  ;;  %v564_v33 = vadd.f32 %v1346_v30, %v1639_v45  ;;  %v843_v26 = vld [vmem:[#allocation2 + $0x178] sm:$0xff]  ;;  %v858_v27 = vld [vmem:[#allocation2 + $0x1f0] sm:$0xff]  ;;  %v857_v29 = vld [vmem:[#allocation2 + $0x1e8] sm:$0xff] }
 0x118   :  { %1228 = vmatpush3.msra.mxu1 %v811_v31  ;;  %v555_v35 = vpop.f32.mrf.mxu0  ;;  %v825_v39 = vld [vmem:[#allocation2 + $0xe8] sm:$0xff]  ;;  %v842_v28 = vld [vmem:[#allocation2 + $0x170] sm:$0xff]  ;;  %v856_v31 = vld [vmem:[#allocation2 + $0x1e0] sm:$0xff] }
 0x119   :  { %1229 = vmatprep.subr.mxu1 %v826_v34  ;;  %764 = vst.msk [vmem:[#allocation2 + $0x108] sm:$0xff] %vm730_vm2, %v699_v32  ;;  %v704_v37 = vmax.f32 %v564_v33, 0.0  ;;  %v556_v38 = vadd.f32 %v1639_v45, %v555_v35  ;;  %v841_v30 = vld [vmem:[#allocation2 + $0x168] sm:$0xff]  ;;  %v840_v32 = vld [vmem:[#allocation2 + $0x160] sm:$0xff]  ;;  %v855_v33 = vld [vmem:[#allocation2 + $0x1d8] sm:$0xff] }
 0x11a   :  { %1230 = vmatpush3.msra.mxu1 %v810_v36  ;;  %v1347_v40 = vpop.f32.mrf.mxu0  ;;  %v853_v36 = vld [vmem:[#allocation2 + $0x1c8] sm:$0xff] }
 0x11b   :  { %1231 = vmatprep.subr.mxu1 %v825_v39  ;;  %769 = vst.msk [vmem:[#allocation2 + $0x130] sm:$0xff] %vm730_vm2, %v704_v37  ;;  %v702_v42 = vmax.f32 %v556_v38, 0.0  ;;  %v567_v44 = vadd.f32 %v1347_v40, %v1639_v45  ;;  %v852_v38 = vld [vmem:[#allocation2 + $0x1c0] sm:$0xff]  ;;  %v851_v40 = vld [vmem:[#allocation2 + $0x1b8] sm:$0xff] }
 0x11c   :  { %1232 = vmatpush3.msra.mxu1 %v809_v41  ;;  %v558_v47 = vpop.f32.mrf.mxu0 }
 0x11d   :  { %1233 = vmatprep.subr.mxu1 %v824_v46  ;;  %767 = vst.msk [vmem:[#allocation2 + $0x120] sm:$0xff] %vm730_vm2, %v702_v42  ;;  %v705_v49 = vmax.f32 %v567_v44, 0.0  ;;  %v559_v50 = vadd.f32 %v1639_v45, %v558_v47  ;;  %v850_v42 = vld [vmem:[#allocation2 + $0x1b0] sm:$0xff]  ;;  %v849_v46 = vld [vmem:[#allocation2 + $0x1a8] sm:$0xff] }
 0x11e   :  { %1234 = vmatpush3.msra.mxu1 %v808_v48  ;;  %v1350_v52 = vpop.f32.mrf.mxu0  ;;  %v848_v48 = vld [vmem:[#allocation2 + $0x1a0] sm:$0xff] }
 0x11f   :  { %1235 = vmatprep.subr.mxu1 %v823_v51  ;;  %770 = vst.msk [vmem:[#allocation2 + $0x138] sm:$0xff] %vm730_vm2, %v705_v49  ;;  %v703_v55 = vmax.f32 %v559_v50, 0.0  ;;  %v580_v56 = vadd.f32 %v1350_v52, %v1639_v45  ;;  %v847_v50 = vld [vmem:[#allocation2 + $0x198] sm:$0xff]  ;;  %v846_v52 = vld [vmem:[#allocation2 + $0x190] sm:$0xff] }
 0x120   :  { %1236 = vmatpush3.msra.mxu1 %v807_v54  ;;  %v571_v58 = vpop.f32.mrf.mxu0  ;;  %v831_v51 = vld [vmem:[#allocation2 + $0x118] sm:$0xff]  ;;  %v830_v54 = vld [vmem:[#allocation2 + $0x110] sm:$0xff] }
 0x121   :  { %1237 = vmatprep.subr.mxu1 %v822_v57  ;;  %768 = vst.msk [vmem:[#allocation2 + $0x128] sm:$0xff] %vm730_vm2, %v703_v55  ;;  %v708_v60 = vmax.f32 %v580_v56, 0.0  ;;  %v572_v61 = vadd.f32 %v1639_v45, %v571_v58  ;;  %v845_v55 = vld [vmem:[#allocation2 + $0x188] sm:$0xff]  ;;  %v844_v57 = vld [vmem:[#allocation2 + $0x180] sm:$0xff] }
 0x122   :  { %1238 = vmatpush3.msra.mxu1 %v806_v59  ;;  %v1351_v63 = vpop.f32.mrf.mxu0  ;;  %v834_v44 = vld [vmem:[#allocation2 + $0x130] sm:$0xff]  ;;  %v829_v56 = vld [vmem:[#allocation2 + $0x108] sm:$0xff]  ;;  %v828_v58 = vld [vmem:[#allocation2 + $0x100] sm:$0xff]  ;;  %v1454_v59 = vmov 0.0  }
 0x123   :  { %1239 = vmatprep.subr.mxu1 %v821_v62  ;;  %773 = vst.msk [vmem:[#allocation2 + $0x150] sm:$0xff] %vm730_vm2, %v708_v60  ;;  %v706_v1 = vmax.f32 %v572_v61, 0.0  ;;  %v583_v2 = vadd.f32 %v1351_v63, %v1639_v45  ;;  %v1025_v60 = vld [vmem:[%s1798_s4 + $0x18] sm:$0xff]  ;;  %v1024_v61 = vld [vmem:[%s1798_s4 + $0x10] sm:$0xff]  ;;  %v1023_v62 = vld [vmem:[%s1798_s4 + $0x8] sm:$0xff] }
 0x124   :  { %1240 = vmatpush3.msra.mxu1 %v805_v0  ;;  %v574_v4 = vpop.f32.mrf.mxu0  ;;  %v832_v49 = vld [vmem:[#allocation2 + $0x120] sm:$0xff] }
 0x125   :  { %1241 = vmatprep.subr.mxu1 %v820_v3  ;;  %771 = vst.msk [vmem:[#allocation2 + $0x140] sm:$0xff] %vm730_vm2, %v706_v1  ;;  %v709_v6 = vmax.f32 %v583_v2, 0.0  ;;  %v575_v7 = vadd.f32 %v1639_v45, %v574_v4  ;;  %v800_v45 = vld [vmem:[#allocation2 + $0x20] sm:$0xff] }
 0x126   :  { %1242 = vmatpush3.msra.mxu1 %v804_v5  ;;  %v835_v41 = vld [vmem:[#allocation2 + $0x138] sm:$0xff] }
 0x127   :  { %1243 = vmatprep.subr.mxu1 %v819_v8  ;;  %774 = vst.msk [vmem:[#allocation2 + $0x158] sm:$0xff] %vm730_vm2, %v709_v6  ;;  %v707_v10 = vmax.f32 %v575_v7, 0.0  ;;  %v1190_v6 = vld [vmem:[%s1799_s5] ss:$0 sm:$0xff] }
 0x128   :  { %1244 = vmatpush3.msra.mxu1 %v803_v9  ;;  %v833_v47 = vld [vmem:[#allocation2 + $0x128] sm:$0xff] }
 0x129   :  { %1245 = vmatprep.subr.mxu1 %v818_v11  ;;  %772 = vst.msk [vmem:[#allocation2 + $0x148] sm:$0xff] %vm730_vm2, %v707_v10 }
 0x12a   :  { %1246 = vmatpush3.msra.mxu1 %v802_v12  ;;  %v838_v35 = vld [vmem:[#allocation2 + $0x150] sm:$0xff] }
 0x12b   :  { %1247 = vmatprep.subr.mxu1 %v817_v13 }
 0x12c   :  { %1248 = vmatpush3.msra.mxu1 %v801_v14  ;;  %v836_v39 = vld [vmem:[#allocation2 + $0x140] sm:$0xff] }
 0x12d   :  { %1249 = vmatprep.subr.mxu1 %v816_v15 }
 0x12e   :  { %1250 = vmatpush3.msra.mxu1 %v800_v45  ;;  %v839_v34 = vld [vmem:[#allocation2 + $0x158] sm:$0xff] }
 0x12f   :  { %1251 = vmatprep.subr.mxu1 %v815_v16 }
 0x130   :  { %1252 = vmatpush3.msra.mxu1 %v799_v17  ;;  %v837_v37 = vld [vmem:[#allocation2 + $0x148] sm:$0xff] }
 0x131   :  { %1253 = vmatprep.subr.mxu1 %v814_v18 }
 0x132   :  { %1254 = vmatpush3.msra.mxu1 %v798_v19 }
 0x133   :  { %1255 = vmatprep.subr.mxu1 %v813_v20 }
 0x134   :  { %1256 = vmatpush3.msra.mxu1 %v797_v21 }
 0x135   :  { %1257 = vmatprep.subr.mxu1 %v812_v22 }
 0x136   :  { %1258 = vmatpush3.msra.mxu1 %v796_v24 }
 0x137   :  { %1262 = vmatprep.subr.mxu1 %v859_v25  ;;  %947 = vmatmul.mubr.f32.vlgmr.msra.gmra.mxu1 %v1632_v43  ;;  %v854_v43 = vld [vmem:[#allocation2 + $0x1d0] sm:$0xff] }
 0x138   :  { %1263 = vmatpush3.msra.mxu1 %v843_v26  ;;  %1016 = vmatprep.mubr.f32.mxu1 %v877_v23 }
 0x139   :  { %1264 = vmatprep.subr.mxu1 %v858_v27 }
 0x13a   :  { %1265 = vmatpush3.msra.mxu1 %v842_v28 }
 0x13b   :  { %1266 = vmatprep.subr.mxu1 %v857_v29 }
 0x13c   :  { %1267 = vmatpush3.msra.mxu1 %v841_v30 }
 0x13d   :  { %1268 = vmatprep.subr.mxu1 %v856_v31 }
 0x13e   :  { %1269 = vmatpush3.msra.mxu1 %v840_v32 }
 0x13f   :  { %1270 = vmatprep.subr.mxu1 %v855_v33 }
 0x140   :  { %1271 = vmatpush3.msra.mxu1 %v839_v34 }
 0x141   :  { %1272 = vmatprep.subr.mxu1 %v854_v43 }
 0x142   :  { %1273 = vmatpush3.msra.mxu1 %v838_v35 }
 0x143   :  { %1274 = vmatprep.subr.mxu1 %v853_v36 }
 0x144   :  { %1275 = vmatpush3.msra.mxu1 %v837_v37 }
 0x145   :  { %1276 = vmatprep.subr.mxu1 %v852_v38 }
 0x146   :  { %1277 = vmatpush3.msra.mxu1 %v836_v39 }
 0x147   :  { %1278 = vmatprep.subr.mxu1 %v851_v40 }
 0x148   :  { %1279 = vmatpush3.msra.mxu1 %v835_v41 }
 0x149   :  { %1280 = vmatprep.subr.mxu1 %v850_v42 }
 0x14a   :  { %1281 = vmatpush3.msra.mxu1 %v834_v44 }
 0x14b   :  { %1282 = vmatprep.subr.mxu1 %v849_v46 }
 0x14c   :  { %1283 = vmatpush3.msra.mxu1 %v833_v47 }
 0x14d   :  { %1284 = vmatprep.subr.mxu1 %v848_v48 }
 0x14e   :  { %1285 = vmatpush3.msra.mxu1 %v832_v49 }
 0x14f   :  { %1286 = vmatprep.subr.mxu1 %v847_v50 }
 0x150   :  { %1287 = vmatpush3.msra.mxu1 %v831_v51 }
 0x151   :  { %1288 = vmatprep.subr.mxu1 %v846_v52 }
 0x152   :  { %1289 = vmatpush3.msra.mxu1 %v830_v54 }
 0x153   :  { %1290 = vmatprep.subr.mxu1 %v845_v55 }
 0x154   :  { %1291 = vmatpush3.msra.mxu1 %v829_v56 }
 0x155   :  { %1292 = vmatprep.subr.mxu1 %v844_v57 }
 0x156   :  { %1293 = vmatpush3.msra.mxu1 %v828_v58 }
 0x157   :  { %1017 = vmatmul.mubr.f32.vlgmr.msra.gmra.mxu1 %v1643_v53  ;;  %1372 = vmatprep.subr.mxu1 %v1454_v59  ;;  %v1022_v53 = vld [vmem:[%s1798_s4] sm:$0xff]  ;;  %s1431_s4 = scalar_lea.vmem %s1115_s28, 32 }
 0x158   :  { %1373 = vmatpush3.msra.mxu1 %v1025_v60  ;;  %1380 = vmatprep.mubr.msk.f32.mxu1 %vm1455_vm3, %v1454_v59  ;;  %p1432_p0 = scmp.ne.s32.totalorder %s1115_s28, %s1431_s4  ;;  %p1437_p2 = scmp.lt.s32.totalorder %s1431_s4, %s1431_s4 }
 0x159   :  { %1374 = vmatprep.subr.mxu1 %v1454_v59 }
 0x15a   :  { %1375 = vmatpush3.msra.mxu1 %v1024_v61  ;;  %p1438_p3 = por %p1437_p2, %p1436_p1 }
 0x15b   :  { %1376 = vmatprep.subr.mxu1 %v1454_v59 }
 0x15c   :  { %1377 = vmatpush3.msra.mxu1 %v1023_v62  ;;  %p1439_p4 = pnand %p1438_p3, %p1432_p0 }
 0x15d   :  { %1378 = vmatprep.subr.mxu1 %v1454_v59 }
 0x15e   :  { %1379 = vmatpush3.msra.mxu1 %v1022_v53 }
 0x1f7   :  { %v1259_v63 = vpop.f32.mrf.mxu1 }
 0x1f9   :  { %v1260_v0 = vpop.f32.mrf.mxu1 }
 0x1fa   :  { %v1261_v3 = vadd.f32 %v1260_v0, %v1259_v63 }
 0x217   :  { %v1294_v1 = vpop.f32.mrf.mxu1 }
 0x219   :  { %v1295_v2 = vpop.f32.mrf.mxu1 }
 0x21a   :  { %v1296_v4 = vadd.f32 %v1295_v2, %v1294_v1 }
 0x21c   :  { %v1019_v5 = vadd.f32 %v1296_v4, %v1261_v3 }
 0x21e   :  { %1381 = vmatmul.mubr.msk.f32.vlgmr.msra.gmra.mxu1 %vm730_vm2, %v1019_v5 }
 0x2de   :  { %v1102_v7 = vpop.f32.mrf.mxu1 }
 0x2df   :  { %v1103_v8 = vadd.f32 %v1190_v6, %v1102_v7 }
 0x2e0   :  { %v1382_v9 = vpop.f32.mrf.mxu1 }
 0x2e1   :  { %1107 = vst.msk [vmem:[#allocation3] sm:$0x3] %vm1106_vm4, %v1103_v8 }
 0x2e2   :  { %1442 = shalt.err (!%p1439_p4)
}
 0x2e3   :  { %1117 = dma.vmem_to_hbm [thread:$0]  %s1115_s28, 32, %s1800_s6, [#allocation4]  }
 0x2e4   :  { %1451 = dma.done.wait [#allocation4], 32  }
 0x2e5   :  { %1452 = vsyncadd [#allocation4], 4294967264 }
 0x2e6   :  { %1121 = vsyncpa [#allocation4], 1 }

</bundles_post_ra>
